<compile_context>
chip_gen: v7x
topology: tpu7x:2x2x1
jax: 0.10.0
libtpu: 0.0.40
codegen_flags: <defaults>
</compile_context>

<pallas_src>
from functools import partial

import numpy as np
import jax
import jax.numpy as jnp
from jax.experimental import pallas as pl
from jax.experimental.pallas import tpu as pltpu

NEG = -100000.0


def _cond_logits_kernel(cond_inds_ref,   # VMEM i32 [tile_bn, 1]
                        uncond_ref,      # VMEM f32 [1, R]        (resident)
                        cond_ref,        # VMEM f32 [C, R]        (resident)
                        priors_ref,      # VMEM f32 [tile_bn, R]
                        masked_ref,      # VMEM f32 [tile_bn, R]  (out)
                        mask_ref):       # VMEM i32 [tile_bn, R]  (out)
    tile_bn = cond_inds_ref.shape[0]
    num_cond = cond_ref.shape[0]

    inds = cond_inds_ref[...]                                     # [tile_bn, 1] i32
    valid = inds >= 0                                             # [tile_bn, 1] bool

    # Vectorized conditional-row gather: one-hot [tile_bn, C] @ conditionals [C, R].
    # f32 MXU path (no integer matmul -> safe on v7x); HIGHEST precision keeps
    # the 0/1 row selection exact in f32.
    col = jax.lax.broadcasted_iota(jnp.int32, (tile_bn, num_cond), 1)
    onehot = (col == inds).astype(jnp.float32)                    # rows of -1 -> all zero
    gathered = jnp.dot(onehot, cond_ref[...],
                       preferred_element_type=jnp.float32,
                       precision=jax.lax.Precision.HIGHEST)       # [tile_bn, R]

    u = uncond_ref[...]                                           # bound once per tile
    action = jnp.where(valid, u + gathered, jnp.float32(NEG))     # [tile_bn, R]

    masked = action + priors_ref[...]                             # [tile_bn, R]
    masked_ref[...] = masked                                      # lane-dense store
    mask_ref[...] = (masked > jnp.float32(NEG)).astype(jnp.int32) # validity mask, free VPU filler


@partial(jax.jit, static_argnames=("tile_bn",))
def _device_forward(cond_inds, unconditionals, conditionals, full_logit_priors,
                    tile_bn=2048):
    """Single-dispatch device path.

    cond_inds:         i32[B, N]   (-1 == node is not a child / doesn't exist)
    unconditionals:    f32[R]
    conditionals:      f32[C, R]
    full_logit_priors: f32[B, N, R]
    returns (masked_logits f32[B, N*R], valid_mask i32[B, N*R], used_priors f32[B, N*R])
    """
    B, N = cond_inds.shape
    C, R = conditionals.shape
    BN = B * N
    tile_bn = min(tile_bn, BN)
    assert BN % tile_bn == 0 and tile_bn % 8 == 0, (BN, tile_bn)

    cond2d = cond_inds.reshape(BN, 1).astype(jnp.int32)
    uncond2d = unconditionals.reshape(1, R).astype(jnp.float32)
    cond_tab = conditionals.astype(jnp.float32)
    priors2d = full_logit_priors.reshape(BN, R).astype(jnp.float32)

    masked, mask = pl.pallas_call(
        _cond_logits_kernel,
        out_shape=(jax.ShapeDtypeStruct((BN, R), jnp.float32),
                   jax.ShapeDtypeStruct((BN, R), jnp.int32)),
        grid_spec=pltpu.PrefetchScalarGridSpec(
            num_scalar_prefetch=0,
            grid=(BN // tile_bn,),
            in_specs=[
                pl.BlockSpec((tile_bn, 1), lambda i: (i, 0)),   # cond indices
                pl.BlockSpec((1, R), lambda i: (0, 0)),         # unconditionals (resident)
                pl.BlockSpec((C, R), lambda i: (0, 0)),         # conditionals (resident)
                pl.BlockSpec((tile_bn, R), lambda i: (i, 0)),   # priors (streamed)
            ],
            out_specs=(
                pl.BlockSpec((tile_bn, R), lambda i: (i, 0)),   # masked logits
                pl.BlockSpec((tile_bn, R), lambda i: (i, 0)),   # validity mask
            ),
        ),
        compiler_params=pltpu.CompilerParams(
            dimension_semantics=("parallel",)),
    )(cond2d, uncond2d, cond_tab, priors2d)

    # used_priors is bit-identical to the (reshaped) input; no kernel writeback.
    used_priors = priors2d.reshape(B, N * R)
    return masked.reshape(B, N * R), mask.reshape(B, N * R), used_priors


def conditional_model_blended_forward(cond_inds, unconditionals, conditionals,
                                      full_logit_priors, *, tile_bn=2048):
    """Equivalent of ConditionalModelBlended.forward (== old_model.forward)."""
    masked_logits, valid_mask, used_priors = _device_forward(
        cond_inds, unconditionals, conditionals, full_logit_priors,
        tile_bn=tile_bn)

    out = {
        "masked_policy_logits": masked_logits,
        "used_priors": used_priors,
        "valid_policy_logits": [],
        "action_inds": [],
    }

    # TODO(synk): the ragged per-graph boolean-mask selection and the
    # cross-model consistency assert on Python graph objects have no Pallas
    # equivalent (variable-length outputs); done on host with a single fused
    # D2H transfer of (masked, mask) and plain numpy results (no re-uploads).
    ml_np, mask_np = jax.device_get((masked_logits, valid_mask))
    n_total = ml_np.shape[1]
    ind_array = np.arange(n_total, dtype=np.int32)
    for i in range(ml_np.shape[0]):
        m = mask_np[i].astype(bool)
        out["valid_policy_logits"].append(ml_np[i][m])
        out["action_inds"].append(ind_array[m])
    return out


def _reference_forward(cond_inds, unconditionals, conditionals, priors):
    B, N = cond_inds.shape
    R = conditionals.shape[1]
    valid = (cond_inds >= 0)[..., None]                     # [B,N,1]
    safe = jnp.maximum(cond_inds, 0)                        # [B,N]
    gathered = conditionals[safe]                           # [B,N,R]
    action = jnp.where(valid, unconditionals[None, None, :] + gathered, NEG)
    masked = (action + priors).reshape(B, N * R)
    return masked, priors.reshape(B, N * R)


if __name__ == "__main__":
    # Small synthetic "grammar" dimensions.
    R = 128    # num_rules         (lane dim, multiple of 128)
    C = 16     # num_conditionals  (rows of the conditionals table)
    B = 2      # number of graphs (batch)
    N = 8      # max_nodes

    key = jax.random.PRNGKey(0)
    k1, k2, k3, k4, k5 = jax.random.split(key, 5)

    # Deterministic synthetic parameters (module inits them as zeros; use small
    # random values so the kernel does non-trivial work).
    unconditionals = 0.1 * jax.random.normal(k1, (R,), dtype=jnp.float32)
    conditionals = 0.1 * jax.random.normal(k2, (C, R), dtype=jnp.float32)

    # Encoded graphs: cond index per node, -1 == not a child node.
    cond_inds = jax.random.randint(k3, (B, N), -1, C, dtype=jnp.int32)

    # full_logit_priors: valid actions get small log-freqs, invalid get -1e5.
    prior_mask = jax.random.bernoulli(k4, p=0.5, shape=(B, N, R))
    prior_vals = 0.5 * jax.random.normal(k5, (B, N, R), dtype=jnp.float32)
    full_logit_priors = jnp.where(prior_mask, prior_vals,
                                  jnp.float32(NEG)).astype(jnp.float32)

    # tile_bn=8 exercises the 1-D parallel grid (2 tiles) at toy size; at real
    # sizes the default (2048) keeps the double-buffered working set well under
    # v7x's 32 MiB scoped VMEM while streaming priors near HBM roofline.
    out = conditional_model_blended_forward(
        cond_inds, unconditionals, conditionals, full_logit_priors, tile_bn=8)
    jax.block_until_ready(out["masked_policy_logits"])
    jax.block_until_ready(out["used_priors"])

    # Correctness check against a pure-JAX reference.
    ref_masked, ref_used = _reference_forward(
        cond_inds, unconditionals, conditionals, full_logit_priors)
    np.testing.assert_allclose(np.asarray(out["masked_policy_logits"]),
                               np.asarray(ref_masked), rtol=1e-6, atol=1e-6)
    np.testing.assert_allclose(np.asarray(out["used_priors"]),
                               np.asarray(ref_used), rtol=1e-6, atol=1e-6)
    ref_np = np.asarray(ref_masked)
    for i in range(B):
        m = ref_np[i] > NEG
        np.testing.assert_allclose(out["valid_policy_logits"][i],
                                   ref_np[i][m], rtol=1e-6, atol=1e-6)
        np.testing.assert_array_equal(out["action_inds"][i],
                                      np.nonzero(m)[0].astype(np.int32))

    print("KERNEL_OK")
</pallas_src>

<mosaic_0001>
module attributes {stable_mosaic.version = 11 : i64} {
  func.func @_cond_logits_kernel(%arg0: i32, %arg1: memref<8x1xi32, #tpu.memory_space<vmem>>, %arg2: memref<1x128xf32, #tpu.memory_space<vmem>>, %arg3: memref<16x128xf32, #tpu.memory_space<vmem>>, %arg4: memref<8x128xf32, #tpu.memory_space<vmem>>, %arg5: memref<8x128xf32, #tpu.memory_space<vmem>>, %arg6: memref<8x128xi32, #tpu.memory_space<vmem>>) attributes {dimension_semantics = [#tpu.dimension_semantics<parallel>], iteration_bounds = array<i64: 2>, scalar_prefetch = 0 : i64, scratch_operands = 0 : i64, tpu.core_type = #tpu.core_type<tc>, window_params = [{transform_indices = @transform_0, window_bounds = array<i64: 8, 1>}, {pipeline_mode = #tpu.pipeline_mode<synchronous>, transform_indices = @transform_1, window_bounds = array<i64: 1, 128>}, {pipeline_mode = #tpu.pipeline_mode<synchronous>, transform_indices = @transform_2, window_bounds = array<i64: 16, 128>}, {transform_indices = @transform_3, window_bounds = array<i64: 8, 128>}, {transform_indices = @transform_4, window_bounds = array<i64: 8, 128>}, {transform_indices = @transform_5, window_bounds = array<i64: 8, 128>}]} {
    %c0 = arith.constant 0 : index
    %c0_0 = arith.constant 0 : index
    %0 = vector.load %arg1[%c0, %c0_0] : memref<8x1xi32, #tpu.memory_space<vmem>>, vector<8x1xi32>
    %c0_i32 = arith.constant 0 : i32
    %1 = vector.broadcast %c0_i32 : i32 to vector<8x1xi32>
    %2 = arith.cmpi sge, %0, %1 : vector<8x1xi32>
    %3 = tpu.iota {dimensions = array<i32: 1>} : vector<8x16xi32>
    %4 = vector.broadcast %0 : vector<8x1xi32> to vector<8x16xi32>
    %5 = arith.cmpi eq, %3, %4 : vector<8x16xi32>
    %6 = arith.extui %5 : vector<8x16xi1> to vector<8x16xi32>
    %7 = arith.sitofp %6 : vector<8x16xi32> to vector<8x16xf32>
    %c0_1 = arith.constant 0 : index
    %c0_2 = arith.constant 0 : index
    %8 = vector.load %arg3[%c0_1, %c0_2] : memref<16x128xf32, #tpu.memory_space<vmem>>, vector<16x128xf32>
    %cst = arith.constant dense<0.000000e+00> : vector<8x128xf32>
    %9 = tpu.matmul %7, %8, %cst {dimension_numbers = #tpu.dot_dimension_numbers<[1], [0], [0], [1], [0, 0, 1, 1], [], []>, precision = #tpu.contract_precision<fp32>} : vector<8x16xf32>, vector<16x128xf32>, vector<8x128xf32> -> vector<8x128xf32>
    %c0_3 = arith.constant 0 : index
    %c0_4 = arith.constant 0 : index
    %10 = vector.load %arg2[%c0_3, %c0_4] : memref<1x128xf32, #tpu.memory_space<vmem>>, vector<1x128xf32>
    %11 = vector.broadcast %10 : vector<1x128xf32> to vector<8x128xf32>
    %12 = arith.addf %11, %9 : vector<8x128xf32>
    %cst_5 = arith.constant -1.000000e+05 : f32
    %13 = vector.shape_cast %2 : vector<8x1xi1> to vector<8x1xi1>
    %14 = vector.broadcast %13 : vector<8x1xi1> to vector<8x128xi1>
    %15 = vector.broadcast %cst_5 : f32 to vector<8x128xf32>
    %16 = arith.select %14, %12, %15 : vector<8x128xi1>, vector<8x128xf32>
    %c0_6 = arith.constant 0 : index
    %c0_7 = arith.constant 0 : index
    %17 = vector.load %arg4[%c0_6, %c0_7] : memref<8x128xf32, #tpu.memory_space<vmem>>, vector<8x128xf32>
    %18 = arith.addf %16, %17 : vector<8x128xf32>
    %c0_8 = arith.constant 0 : index
    %c0_9 = arith.constant 0 : index
    %19 = vector.load %arg5[%c0_8, %c0_9] : memref<8x128xf32, #tpu.memory_space<vmem>>, vector<8x128xf32>
    tpu.vector_store %arg5[%c0_8, %c0_9], %18 {strides = array<i32>} : memref<8x128xf32, #tpu.memory_space<vmem>>, vector<8x128xf32>,
    %cst_10 = arith.constant -1.000000e+05 : f32
    %20 = vector.broadcast %cst_10 : f32 to vector<8x128xf32>
    %21 = arith.cmpf ogt, %18, %20 : vector<8x128xf32>
    %22 = arith.extui %21 : vector<8x128xi1> to vector<8x128xi32>
    %c0_11 = arith.constant 0 : index
    %c0_12 = arith.constant 0 : index
    %23 = vector.load %arg6[%c0_11, %c0_12] : memref<8x128xi32, #tpu.memory_space<vmem>>, vector<8x128xi32>
    tpu.vector_store %arg6[%c0_11, %c0_12], %22 {strides = array<i32>} : memref<8x128xi32, #tpu.memory_space<vmem>>, vector<8x128xi32>,
    return
  }
  func.func @transform_0(%arg0: i32) -> (i32, i32) {
    %c0_i32 = arith.constant 0 : i32
    %c0_i32_0 = arith.constant 0 : i32
    return %arg0, %c0_i32 : i32, i32
  }
  func.func @transform_1(%arg0: i32) -> (i32, i32) {
    %c0_i32 = arith.constant 0 : i32
    %c0_i32_0 = arith.constant 0 : i32
    %c0_i32_1 = arith.constant 0 : i32
    return %c0_i32, %c0_i32_0 : i32, i32
  }
  func.func @transform_2(%arg0: i32) -> (i32, i32) {
    %c0_i32 = arith.constant 0 : i32
    %c0_i32_0 = arith.constant 0 : i32
    %c0_i32_1 = arith.constant 0 : i32
    return %c0_i32, %c0_i32_0 : i32, i32
  }
  func.func @transform_3(%arg0: i32) -> (i32, i32) {
    %c0_i32 = arith.constant 0 : i32
    %c0_i32_0 = arith.constant 0 : i32
    return %arg0, %c0_i32 : i32, i32
  }
  func.func @transform_4(%arg0: i32) -> (i32, i32) {
    %c0_i32 = arith.constant 0 : i32
    %c0_i32_0 = arith.constant 0 : i32
    return %arg0, %c0_i32 : i32, i32
  }
  func.func @transform_5(%arg0: i32) -> (i32, i32) {
    %c0_i32 = arith.constant 0 : i32
    %c0_i32_0 = arith.constant 0 : i32
    return %arg0, %c0_i32 : i32, i32
  }
}

</mosaic_0001>

<bundles_post_ra>
// kernel: _device_forward.1
= control target key start
LH: loop header
LB: loop body
LE: loop exit
PB: predicated region body
PF: predicated region fallthrough
CT: control target
= control target key end

     0   :  { %11 = vsyncpa [#allocation3], 0  ;;  %s1065_s18 = smov 0   ;;  %s1149_s0 = inlined_call_operand.vmem [shape: s32[16,1], index: 0, kind: input, shape index: {}]   ;;  %s1150_s1 = inlined_call_operand.vmem [shape: f32[1,128], index: 1, kind: input, shape index: {}]   ;;  %s1151_s2 = inlined_call_operand.hbm [shape: f32[16,128], index: 2, kind: input, shape index: {}]   ;;  %s1152_s3 = inlined_call_operand.vmem [shape: f32[16,128], index: 3, kind: input, shape index: {}]   ;;  %s1153_s4 = inlined_call_operand.vmem [shape: f32[16,128], index: 4, kind: output, shape index: {0}]   ;;  %s1154_s5 = inlined_call_operand.vmem [shape: s32[16,128], index: 5, kind: output, shape index: {1}]  }
   0x1 LB: > { %s1071_s19 = sadd.s32 4294967295, %s1026_s18   ;;  %p868_p0 = scmp.ge.s32.totalorder %s1026_s18, 1  ;;  %s1026_s18 = sphi %s1065_s18, %s17_s18  }
   0x2   : > { %p168_p1 = scmp.lt.s32.totalorder %s1026_s18, 3  ;;  %s1028_s20 = smov [#allocation2]  }
   0x3   : > { %s183_s21 = sshll.u32 %s1028_s20, 4  ;;  %p1155_p3 = scmp.eq.s32.totalorder %s1071_s19, 0  ;;  %s184_s21 = int_to_ptr.vmem [resolvable:$true] %s183_s21 }
   0x4   : > { %p1075_p2 = pnand %p868_p0, %p168_p1  ;;  %s988_s26 = scalar_lea.hbm %s1151_s2, 256 }
   0x5   : > { %p989_p6 = scmp.ne.s32.totalorder %s1151_s2, %s988_s26  ;;  %p995_p10 = scmp.lt.u32.totalorder %s988_s26, %s1151_s2 }
   0x6   : > { %s1157_s22 = scalar_select %p1075_p2, 1, 0 }
   0x7   : > { %p966_p4 = pneg %p1075_p2 }
   0x9   : > { %p1084_p5 = pnand %p1155_p3, %p966_p4 }
   0xb   : > { %p990_p7 = pneg %p1084_p5 }
   0xd   : > { %p991_p8 = pnand %p990_p7, %p989_p6 }
   0xf   : > { %p992_p9 = pneg %p991_p8 }
  0x11   : > { %p997_p11 = pnand %p995_p10, %p992_p9 }
  0x13   : > { %1000 = shalt.err (!%p997_p11)
}
  0x14   : > { %s1001_s6 = scalar_lea.vmem %s184_s21, 256  ;;  %p1009_p1 = scmp.lt.s32.totalorder %s184_s21, %s184_s21 }
  0x15   : > { %p1002_p12 = scmp.ne.s32.totalorder %s184_s21, %s1001_s6  ;;  %p1010_p4 = scmp.lt.s32.totalorder %s1001_s6, %s1001_s6 }
  0x17   : > { %p1004_p13 = pnand %p1002_p12, %p990_p7  ;;  %p1011_p3 = por %p1010_p4, %p1009_p1 }
  0x19   : > { %p1005_p0 = pneg %p1004_p13 }
  0x1b   : > { %p1012_p2 = pnand %p1011_p3, %p1005_p0 }
  0x1d   : > { %1015 = shalt.err (!%p1012_p2)
}
  0x1e   : > { %s1029_s7 = smov 128   ;;  %s1030_s8 = smov 8  }
  0x1f   : > { %969 = dma.hbm_to_vmem [thread:$0]  (!%p1084_p5), %s1151_s2, 256, %s184_s21, [#allocation3], %s1029_s7, %s1029_s7, %s1030_s8  }
  0x20   : > { %p1159_p6 = scmp.ne.s32.totalorder %s1157_s22, 0 }
  0x21   : > { %p1160_p8 = scmp.eq.s32.totalorder (!%p1159_p6), %s1071_s19, 0 }
  0x22   : > { %213 = sbr.rel (%p1159_p6) target bundleno = 419 (0x1a3), region = 36 }
  0x29   : > { %1021 = dma.done.wait (%p1160_p8), [#allocation3], 256   ;;  %p1161_p7 = pmov %p1160_p8 }
  0x2a   : > { %p247_p2 = scmp.lt.s32.totalorder %s1071_s19, 1  ;;  %v1031_v0 = vmov 0   ;;  %v1032_v1 = vmov 0.0|0.0   ;;  %v273_v3 = vld [vmem:[#allocation2] sm:$0xff]  ;;  %v274_v4 = vld [vmem:[#allocation2 + $0x8] sm:$0xff]  ;;  %vm1033_vm1 = vmmov 0   ;;  %v265_v21 = vlaneseq }
  0x2b   : > { %1023 = vsyncadd (%p1161_p7), [#allocation3], 4294967040  ;;  %987 = vset.pattern.permute.xlu0 %v1031_v0  ;;  %947 = vmatprep.subr.bf16.mxu1 %v1032_v1  ;;  %v280_v5 = vand.u32 4294901760, %v273_v3  ;;  %v283_v6 = vand.u32 4294901760, %v274_v4  ;;  %v1034_v8 = vmov 0.0   ;;  %vm275_vm2 = vcmask 130048  }
  0x2c   : > { %s1163_s19 = smov (!%p247_p2, %s1071_s19), 1  ;;  %944 = vmatprep.subr.bf16.mxu0 %v1032_v1  ;;  %913 = vmatprep.mubr.msk.f32.mxu1 %vm1033_vm1, %v1034_v8  ;;  %v266_v22 = vand.u32 127, %v265_v21  ;;  %v881_v46 = vld [vmem:[%s1150_s1] ss:$0 sm:$0xff] }
  0x2d   : > { %s1113_s11 = sshll.u32 %s1163_s19, 3  ;;  %906 = vmatprep.mubr.msk.f32.mxu0 %vm1033_vm1, %v1034_v8  ;;  %v358_v9 = vsub.f32 %v273_v3, %v280_v5  ;;  %v365_v10 = vsub.f32 %v274_v4, %v283_v6  ;;  %v945_v11 = vpack.c.bf16 %v283_v6, %v280_v5 }
  0x2e   : > { %s250_s14 = scalar_lea.vmem %s1149_s0, %s1113_s11  ;;  %s254_s17 = scalar_lea.vmem %s1152_s3, %s1113_s11 }
  0x2f   : > { %v263_v2 = vld [vmem:[%s250_s14] sm:$0xff]  ;;  %v359_v12 = vand.u32 4294901760, %v358_v9  ;;  %v366_v13 = vand.u32 4294901760, %v365_v10  ;;  %946 = vmatpush3.bf16.msra.mxu0 %v945_v11  ;;  %v951_v19 = vpack.c.bf16 %v365_v10, %v358_v9  ;;  %s258_s23 = scalar_lea.vmem %s1153_s4, %s1113_s11  ;;  %s262_s26 = scalar_lea.vmem %s1154_s5, %s1113_s11 }
  0x30   : > { %268 = vperm.xlu0 %987, %v263_v2   ;;  %vm264_vm0 = vcmp.ge.s32.totalorder %v263_v2, 0  ;;  %950 = vmatprep.subr.bf16.mxu0 %v1032_v1  ;;  %v752_v50 = vld [vmem:[%s254_s17] sm:$0xff] }
  0x31   : > { %v746_v7 = vsel %vm264_vm0, 1, %v1031_v0  ;;  %v360_v14 = vsub.f32 %v358_v9, %v359_v12  ;;  %v367_v15 = vsub.f32 %v365_v10, %v366_v13  ;;  %v957_v20 = vpack.c.bf16 %v366_v13, %v359_v12 }
  0x33   : > { %v361_v16 = vand.u32 4294901760, %v360_v14  ;;  %v368_v17 = vand.u32 4294901760, %v367_v15 }
  0x34   : > { %748 = vperm.xlu0 %987, %v746_v7  }
  0x35   : > { %v948_v18 = vpack.c.bf16 %v368_v17, %v361_v16 }
  0x37   : > { %949 = vmatpush3.bf16.msra.mxu1 %v948_v18 }
  0x38   : > { %953 = vmatprep.subr.bf16.mxu1 %v1032_v1 }
  0xaf   : > { %v269_v23 = vpop.permute.xlu0 %268 }
  0xb0   : > { %vm270_vm3 = vcmp.eq.s32.totalorder %v266_v22, %v269_v23 }
  0xb1   : > { %v877_v24 = vsel %vm270_vm3, 1.0, %v1034_v8 }
  0xb2   : > { %v277_v25 = vsel %vm275_vm2, %v877_v24, 0  ;;  %914 = vmatmul.mubr.msk.f32.vlgmr.msra.gmra.mrb[0].mxu1 %vm275_vm2, %v877_v24 }
  0xb3   : > { %v347_v26 = vsub.f32 %v277_v25, %v277_v25  ;;  %955 = vmatpush3.bf16.msra.mxu1 %v945_v11  ;;  %927 = vmatprep.mubr.msk.f32.mxu1 %vm1033_vm1, %v1034_v8  ;;  %v749_v47 = vpop.permute.xlu0 %748 }
  0xb4   : > { %959 = vmatprep.subr.bf16.mxu1 %v1032_v1  ;;  %vm750_vm4 = vcmp.eq.s32.totalorder %v749_v47, 1 }
  0xb5   : > { %v348_v27 = vand.u32 4294901760, %v347_v26 }
  0xb7   : > { %928 = vmatmul.mubr.f32.vlgmr.msra.gmra.mrb[2].mxu1 %v348_v27  ;;  %v349_v28 = vsub.f32 %v347_v26, %v348_v27 }
  0xb8   : > { %961 = vmatpush3.bf16.msra.mxu1 %v945_v11  ;;  %941 = vmatprep.mubr.msk.f32.mxu1 %vm1033_vm1, %v1034_v8 }
  0xb9   : > { %v350_v29 = vand.u32 4294901760, %v349_v28 }
  0xbb   : > { %907 = vmatmul.mubr.f32.vlgmr.msra.gmra.mrb[0].mxu0 %v350_v29  ;;  %942 = vmatmul.mubr.msk.f32.vlgmr.msra.gmra.mrb[4].mxu1 %vm275_vm2, %v877_v24 }
  0xbc   : > { %952 = vmatpush3.bf16.msra.mxu0 %v951_v19  ;;  %920 = vmatprep.mubr.msk.f32.mxu0 %vm1033_vm1, %v1034_v8 }
  0xbd   : > { %956 = vmatprep.subr.bf16.mxu0 %v1032_v1 }
  0xbf   : > { %921 = vmatmul.mubr.f32.vlgmr.msra.gmra.mrb[2].mxu0 %v347_v26 }
  0xc0   : > { %958 = vmatpush3.bf16.msra.mxu0 %v957_v20  ;;  %934 = vmatprep.mubr.msk.f32.mxu0 %vm1033_vm1, %v1034_v8 }
  0xc3   : > { %935 = vmatmul.mubr.msk.f32.vlgmr.msra.gmra.mrb[4].mxu0 %vm275_vm2, %v877_v24 }
 0x185   : > { %v433_v30 = vpop.f32.mrb[0].mxu1 }
 0x186   : > { %v915_v31 = vpop.f32.mrb[1].mxu1 }
 0x18a   : > { %v584_v32 = vpop.f32.mrb[2].mxu1 }
 0x18b   : > { %v929_v33 = vpop.f32.mrb[3].mxu1 }
 0x18e   : > { %v352_v34 = vpop.f32.mrb[0].mxu0  ;;  %v734_v35 = vpop.f32.mrb[4].mxu1 }
 0x18f   : > { %v434_v36 = vadd.f32 %v433_v30, %v352_v34  ;;  %v908_v37 = vpop.f32.mrb[1].mxu0  ;;  %v943_v38 = vpop.f32.mrb[5].mxu1 }
 0x192   : > { %v509_v39 = vpop.f32.mrb[2].mxu0 }
 0x193   : > { %v510_v40 = vadd.f32 %v509_v39, %v434_v36  ;;  %v922_v41 = vpop.f32.mrb[3].mxu0 }
 0x195   : > { %v585_v42 = vadd.f32 %v584_v32, %v510_v40 }
 0x196   : > { %v661_v43 = vpop.f32.mrb[4].mxu0 }
 0x197   : > { %v662_v44 = vadd.f32 %v661_v43, %v585_v42  ;;  %v936_v45 = vpop.f32.mrb[5].mxu0 }
 0x199   : > { %v735_v48 = vadd.f32 %v734_v35, %v662_v44 }
 0x19b   : > { %v745_v49 = vadd.f32 %v881_v46, %v735_v48 }
 0x19d   : > { %v751_v51 = vsel %vm750_vm4, %v745_v49, -100000.0 }
 0x19e   : > { %v753_v52 = vadd.f32 %v752_v50, %v751_v51 }
 0x1a0   : > { %754 = vst [vmem:[%s258_s23] sm:$0xff] %v753_v52  ;;  %vm755_vm5 = vcmp.gt.f32.partialorder %v753_v52, -100000.0 }
 0x1a1   : > { %v756_v53 = vsel %vm755_vm5, 1, %v1031_v0 }
 0x1a2   : > { %757 = vst [vmem:[%s262_s26] sm:$0xff] %v756_v53 }
 0x1a3 PF: > { %s17_s18 = sadd.s32 1, %s1026_s18  }
 0x1a4   : > { %p14_p3 = scmp.ge.s32.totalorder %s17_s18, 4  }
 0x1a6   :  { %16 = sbr.rel (!%p14_p3) target bundleno = 1 (0x1), region = 86 }
 0x1ad   :  { %791 = vsyncpa [#allocation3], 1 }
 0x1ae   :  { %793 = vsyncpa [#allocation3 + $0x1], 1 }

</bundles_post_ra>
